<compile_context>
chip_gen: v6e
topology: v6e:2x2x1
jax: 0.10.0
libtpu: 0.0.40
codegen_flags: <defaults>
</compile_context>

<pallas_src>
import functools
import math

import jax
import jax.numpy as jnp
from jax.experimental import pallas as pl
from jax.experimental.pallas import tpu as pltpu


def _sinusoidal_kernel(t_ref, tbl_ref, out_ref, *, r):
    # t_ref:   (tile_rows, r)      packed f32 timesteps (r consecutive batch rows / row)
    # tbl_ref: (3, width)          resident lane table:
    #                                row 0: exp(-scale * k)   (frequency per lane)
    #                                row 1: 1.0 for sin lanes, 0.0 for cos lanes
    #                                row 2: which of the r packed timesteps this lane uses
    # out_ref: (tile_rows, width)  width = r * dim  (lane-dense, 128 when r > 1)
    freqs = tbl_ref[0:1, :]
    sin_sel = tbl_ref[1:2, :]
    t = t_ref[...]

    if r == 1:
        t_exp = t                               # (tile_rows, 1) broadcasts across lanes
    else:
        # Expand t across lanes: t_exp[row, c] = t[row, c // dim].
        # Static unrolled chain of VPU selects — exact (pure value passthrough),
        # no MXU (would lose f32 bits), no lane gather.
        j_row = tbl_ref[2:3, :]
        t_exp = t[:, 0:1]
        for j in range(1, r):
            t_exp = jnp.where(j_row == float(j), t[:, j : j + 1], t_exp)

    args = t_exp * freqs                        # exact f32 VPU multiply (matches reference)

    # Single full-width aligned store; sin/cos chosen per lane by the resident mask.
    # TODO(synk): on v7x (3.2 TB/s roofline) consider sin(args + phase) to halve EUP
    # work — kept the exact sin/cos select here for bit-parity with the reference.
    out_ref[...] = jnp.where(sin_sel != 0.0, jnp.sin(args), jnp.cos(args))


def sinusoidal_position_embeddings(time, dim, *, target_tile_bytes=1 << 20,
                                   single_block_bytes=2 << 20):
    """Pallas TPU implementation of SinusoidalPositionEmbeddings.forward.

    time: (B,) float array of timesteps.
    dim:  embedding dimension (must be even, > 2).
    returns: (B, dim) float32 embeddings.
    """
    assert dim % 2 == 0, "dim must be even (PyTorch module silently drops a column otherwise)"
    half_dim = dim // 2
    assert half_dim > 1, "dim must be > 2 (half_dim - 1 == 0 divides by zero)"
    scale = math.log(10000.0) / (half_dim - 1)

    t = jnp.asarray(time).astype(jnp.float32).reshape(-1)
    batch = t.shape[0]

    # Lane-dense packing factor: r batch rows per packed row so the kernel lane width
    # is a full 128-lane vreg even for small dim.
    r = (128 // dim) if (dim < 128 and 128 % dim == 0) else 1
    width = r * dim

    # Pad batch only up to a multiple of r (0 in the common power-of-two case).
    b_pad = pl.cdiv(batch, r) * r
    rows = b_pad // r
    if b_pad != batch:
        t = jnp.pad(t, (0, b_pad - batch))
    t2d = t.reshape(rows, r)                    # same HBM bytes as (b_pad,) — free view

    # Size tiles by bytes (~1 MiB); single-block fast path for the common small case.
    row_bytes = width * 4
    if rows * row_bytes <= single_block_bytes:
        tile_rows = rows                        # one grid step, no pipelining machinery
    else:
        tile_rows = max(8, (target_tile_bytes // row_bytes) // 8 * 8)
    grid = (pl.cdiv(rows, tile_rows),)          # trailing partial block is masked by Pallas

    # Resident per-lane table (DMA'd once; index_map -> (0, 0)).
    lane = jnp.arange(width, dtype=jnp.int32)
    pos = lane % dim
    k = jnp.where(pos < half_dim, pos, pos - half_dim).astype(jnp.float32)
    tbl = jnp.stack(
        [jnp.exp(-scale * k),                       # frequency per lane
         (pos < half_dim).astype(jnp.float32),      # sin-lane mask
         (lane // dim).astype(jnp.float32)],        # lane -> packed-timestep index
        axis=0)                                     # (3, width)

    out = pl.pallas_call(
        functools.partial(_sinusoidal_kernel, r=r),
        out_shape=jax.ShapeDtypeStruct((rows, width), jnp.float32),
        grid=grid,
        in_specs=[pl.BlockSpec((tile_rows, r), lambda i: (i, 0)),
                  pl.BlockSpec((3, width), lambda i: (0, 0))],
        out_specs=pl.BlockSpec((tile_rows, width), lambda i: (i, 0)),
        compiler_params=pltpu.CompilerParams(dimension_semantics=("parallel",)),
    )(t2d, tbl)

    # Row-major view back to (b_pad, dim) — same bytes, no data movement.
    out = out.reshape(b_pad, dim)
    # TODO(synk): for a larger end-to-end win, fuse the downstream time_mlp Linear into
    # this kernel so the (B, dim) slab never round-trips HBM.
    return out if b_pad == batch else out[:batch]


def _reference(time, dim):
    # Pure-JAX reference mirroring the PyTorch forward.
    half_dim = dim // 2
    scale = math.log(10000.0) / (half_dim - 1)
    freqs = jnp.exp(jnp.arange(half_dim, dtype=jnp.float32) * -scale)
    args = time.astype(jnp.float32)[:, None] * freqs[None, :]
    return jnp.concatenate([jnp.sin(args), jnp.cos(args)], axis=-1)


def _check(out, ref):
    # Tolerance allows a few ULP of transcendental / range-reduction difference between
    # the in-kernel sin/cos and XLA's for timestep arguments up to ~1000.
    assert out.shape == ref.shape, (out.shape, ref.shape)
    assert jnp.allclose(out, ref, atol=2e-4, rtol=2e-4), float(jnp.max(jnp.abs(out - ref)))


if __name__ == "__main__":
    key = jax.random.PRNGKey(0)

    # Common diffusion case: small batch, dim=32 -> lane-packed r=4, single-block path.
    batch, dim = 8, 32
    time = jax.random.uniform(key, (batch,), dtype=jnp.float32, minval=0.0, maxval=1000.0)
    out = jax.block_until_ready(sinusoidal_position_embeddings(time, dim))
    _check(out, _reference(time, dim))

    # Ragged batch (not a multiple of the packing factor r=4): exercises pad + slice path.
    t2 = jax.random.uniform(jax.random.PRNGKey(1), (37,), dtype=jnp.float32,
                            minval=0.0, maxval=1000.0)
    out2 = jax.block_until_ready(sinusoidal_position_embeddings(t2, dim))
    _check(out2, _reference(t2, dim))

    # Multi-step grid with a partial trailing block (forced tiny tiles), dim=64 -> r=2.
    t3 = jax.random.uniform(jax.random.PRNGKey(2), (200,), dtype=jnp.float32,
                            minval=0.0, maxval=1000.0)
    out3 = jax.block_until_ready(
        sinusoidal_position_embeddings(t3, 64, target_tile_bytes=8 * 128 * 4,
                                       single_block_bytes=0))
    _check(out3, _reference(t3, 64))

    # No-packing path (dim >= 128 -> r=1).
    t4 = jax.random.uniform(jax.random.PRNGKey(3), (16,), dtype=jnp.float32,
                            minval=0.0, maxval=1000.0)
    out4 = jax.block_until_ready(sinusoidal_position_embeddings(t4, 128))
    _check(out4, _reference(t4, 128))

    print("KERNEL_OK")
</pallas_src>

<mosaic_0001>
module attributes {stable_mosaic.version = 11 : i64} {
  func.func @_sinusoidal_kernel(%arg0: i32, %arg1: memref<2x4xf32, #tpu.memory_space<vmem>>, %arg2: memref<3x128xf32, #tpu.memory_space<vmem>>, %arg3: memref<2x128xf32, #tpu.memory_space<vmem>>) attributes {dimension_semantics = [#tpu.dimension_semantics<parallel>], iteration_bounds = array<i64: 1>, scalar_prefetch = 0 : i64, scratch_operands = 0 : i64, tpu.core_type = #tpu.core_type<tc>, window_params = [{transform_indices = @transform_0, window_bounds = array<i64: 2, 4>}, {pipeline_mode = #tpu.pipeline_mode<synchronous>, transform_indices = @transform_1, window_bounds = array<i64: 3, 128>}, {transform_indices = @transform_2, window_bounds = array<i64: 2, 128>}]} {
    %c0 = arith.constant 0 : index
    %c0_0 = arith.constant 0 : index
    %0 = vector.load %arg2[%c0, %c0_0] : memref<3x128xf32, #tpu.memory_space<vmem>>, vector<1x128xf32>
    %c1 = arith.constant 1 : index
    %c0_1 = arith.constant 0 : index
    %1 = vector.load %arg2[%c1, %c0_1] : memref<3x128xf32, #tpu.memory_space<vmem>>, vector<1x128xf32>
    %c0_2 = arith.constant 0 : index
    %c0_3 = arith.constant 0 : index
    %2 = vector.load %arg1[%c0_2, %c0_3] : memref<2x4xf32, #tpu.memory_space<vmem>>, vector<2x4xf32>
    %c2 = arith.constant 2 : index
    %c0_4 = arith.constant 0 : index
    %3 = vector.load %arg2[%c2, %c0_4] : memref<3x128xf32, #tpu.memory_space<vmem>>, vector<1x128xf32>
    %4 = vector.extract_strided_slice %2 {offsets = [0, 0], sizes = [2, 1], strides = [1, 1]} : vector<2x4xf32> to vector<2x1xf32>
    %cst = arith.constant 1.000000e+00 : f32
    %5 = vector.broadcast %cst : f32 to vector<1x128xf32>
    %6 = arith.cmpf oeq, %3, %5 : vector<1x128xf32>
    %7 = vector.extract_strided_slice %2 {offsets = [0, 1], sizes = [2, 1], strides = [1, 1]} : vector<2x4xf32> to vector<2x1xf32>
    %8 = vector.shape_cast %6 : vector<1x128xi1> to vector<1x128xi1>
    %9 = vector.broadcast %8 : vector<1x128xi1> to vector<2x128xi1>
    %10 = vector.shape_cast %7 : vector<2x1xf32> to vector<2x1xf32>
    %11 = vector.broadcast %10 : vector<2x1xf32> to vector<2x128xf32>
    %12 = vector.shape_cast %4 : vector<2x1xf32> to vector<2x1xf32>
    %13 = vector.broadcast %12 : vector<2x1xf32> to vector<2x128xf32>
    %14 = arith.select %9, %11, %13 : vector<2x128xi1>, vector<2x128xf32>
    %cst_5 = arith.constant 2.000000e+00 : f32
    %15 = vector.broadcast %cst_5 : f32 to vector<1x128xf32>
    %16 = arith.cmpf oeq, %3, %15 : vector<1x128xf32>
    %17 = vector.extract_strided_slice %2 {offsets = [0, 2], sizes = [2, 1], strides = [1, 1]} : vector<2x4xf32> to vector<2x1xf32>
    %18 = vector.shape_cast %16 : vector<1x128xi1> to vector<1x128xi1>
    %19 = vector.broadcast %18 : vector<1x128xi1> to vector<2x128xi1>
    %20 = vector.shape_cast %17 : vector<2x1xf32> to vector<2x1xf32>
    %21 = vector.broadcast %20 : vector<2x1xf32> to vector<2x128xf32>
    %22 = arith.select %19, %21, %14 : vector<2x128xi1>, vector<2x128xf32>
    %cst_6 = arith.constant 3.000000e+00 : f32
    %23 = vector.broadcast %cst_6 : f32 to vector<1x128xf32>
    %24 = arith.cmpf oeq, %3, %23 : vector<1x128xf32>
    %25 = vector.extract_strided_slice %2 {offsets = [0, 3], sizes = [2, 1], strides = [1, 1]} : vector<2x4xf32> to vector<2x1xf32>
    %26 = vector.shape_cast %24 : vector<1x128xi1> to vector<1x128xi1>
    %27 = vector.broadcast %26 : vector<1x128xi1> to vector<2x128xi1>
    %28 = vector.shape_cast %25 : vector<2x1xf32> to vector<2x1xf32>
    %29 = vector.broadcast %28 : vector<2x1xf32> to vector<2x128xf32>
    %30 = arith.select %27, %29, %22 : vector<2x128xi1>, vector<2x128xf32>
    %31 = vector.broadcast %0 : vector<1x128xf32> to vector<2x128xf32>
    %32 = arith.mulf %30, %31 : vector<2x128xf32>
    %cst_7 = arith.constant 0.000000e+00 : f32
    %33 = vector.broadcast %cst_7 : f32 to vector<1x128xf32>
    %34 = arith.cmpf one, %1, %33 : vector<1x128xf32>
    %35 = math.sin %32 : vector<2x128xf32>
    %36 = math.cos %32 : vector<2x128xf32>
    %37 = vector.shape_cast %34 : vector<1x128xi1> to vector<1x128xi1>
    %38 = vector.broadcast %37 : vector<1x128xi1> to vector<2x128xi1>
    %39 = arith.select %38, %35, %36 : vector<2x128xi1>, vector<2x128xf32>
    %c0_8 = arith.constant 0 : index
    %c0_9 = arith.constant 0 : index
    %40 = vector.load %arg3[%c0_8, %c0_9] : memref<2x128xf32, #tpu.memory_space<vmem>>, vector<2x128xf32>
    tpu.vector_store %arg3[%c0_8, %c0_9], %39 {strides = array<i32>} : memref<2x128xf32, #tpu.memory_space<vmem>>, vector<2x128xf32>,
    return
  }
  func.func @transform_0(%arg0: i32) -> (i32, i32) {
    %c0_i32 = arith.constant 0 : i32
    %c0_i32_0 = arith.constant 0 : i32
    return %arg0, %c0_i32 : i32, i32
  }
  func.func @transform_1(%arg0: i32) -> (i32, i32) {
    %c0_i32 = arith.constant 0 : i32
    %c0_i32_0 = arith.constant 0 : i32
    %c0_i32_1 = arith.constant 0 : i32
    return %c0_i32, %c0_i32_0 : i32, i32
  }
  func.func @transform_2(%arg0: i32) -> (i32, i32) {
    %c0_i32 = arith.constant 0 : i32
    %c0_i32_0 = arith.constant 0 : i32
    return %arg0, %c0_i32 : i32, i32
  }
}

</mosaic_0001>

<bundles_post_ra>
// kernel: tpu_custom_call.1
= control target key start
LH: loop header
LB: loop body
LE: loop exit
PB: predicated region body
PF: predicated region fallthrough
CT: control target
= control target key end

     0   :  { %7 = vsyncpa [#allocation3], 0  ;;  %s494_s0 = inlined_call_operand.hbm [shape: f32[2,4], index: 0, kind: input, shape index: {}]   ;;  %s495_s1 = inlined_call_operand.hbm [shape: f32[3,128], index: 1, kind: input, shape index: {}]   ;;  %s496_s2 = inlined_call_operand.hbm [shape: f32[2,128], index: 2, kind: output, shape index: {}]  }
   0x1   :  { %8 = vsyncpa [#allocation6], 0 }
   0x2   :  { %9 = vsyncpa [#allocation4], 0  ;;  %s419_s9 = smov [#allocation2]   ;;  %s420_s11 = smov [#allocation5]  }
   0x3   :  { %s16_s10 = sshll.u32 %s419_s9, 4  ;;  %s26_s12 = sshll.u32 %s420_s11, 4  ;;  %s17_s10 = int_to_ptr.vmem [resolvable:$true] %s16_s10  ;;  %s27_s12 = int_to_ptr.vmem [resolvable:$true] %s26_s12 }
   0x4   :  { %s361_s13 = scalar_lea.vmem %s17_s10, 32  ;;  %p366_p1 = scmp.lt.s32.totalorder %s17_s10, %s17_s10 }
   0x5   :  { %p362_p0 = scmp.ne.s32.totalorder %s17_s10, %s361_s13  ;;  %p367_p2 = scmp.lt.s32.totalorder %s361_s13, %s361_s13 }
   0x7   :  { %p368_p3 = por %p367_p2, %p366_p1 }
   0x9   :  { %p369_p4 = pnand %p368_p3, %p362_p0 }
   0xb   :  { %372 = shalt.err (!%p369_p4)
}
   0xc   :  { %19 = dma.hbm_to_vmem [thread:$0]  %s494_s0, 32, %s17_s10, [#allocation3]  }
   0xd   :  { %s381_s16 = scalar_lea.vmem %s27_s12, 64  ;;  %p386_p6 = scmp.lt.s32.totalorder %s27_s12, %s27_s12 }
   0xe   :  { %p382_p5 = scmp.ne.s32.totalorder %s27_s12, %s381_s16  ;;  %p387_p7 = scmp.lt.s32.totalorder %s381_s16, %s381_s16 }
  0x10   :  { %p388_p8 = por %p387_p7, %p386_p6 }
  0x12   :  { %p389_p9 = pnand %p388_p8, %p382_p5 }
  0x14   :  { %392 = shalt.err (!%p389_p9)
}
  0x15   :  { %29 = dma.hbm_to_vmem [thread:$0]  %s495_s1, 64, %s27_s12, [#allocation6]  }
  0x16   :  { %413 = dma.done.wait [#allocation3], 32  }
  0x17   :  { %414 = vsyncadd [#allocation3], 4294967264 }
  0x18   :  { %415 = dma.done.wait [#allocation6], 64  }
  0x19   :  { %416 = vsyncadd [#allocation6], 4294967232  ;;  %v421_v0 = vmov 1   ;;  %v422_v1 = vmov 2   ;;  %v38_v2 = vld [vmem:[#allocation2] sm:$0x3]  ;;  %v42_v5 = vlaneseq }
  0x1a   :  { %344 = vset.pattern.permute.xlu0 %v421_v0  ;;  %346 = vset.pattern.permute.xlu1 %v422_v1  ;;  %v423_v3 = vmov 0   ;;  %v424_v4 = vmov 3   ;;  %v39_v6 = vld [vmem:[#allocation5 + $0x2] sm:$0x1]  ;;  %v318_v20 = vld [vmem:[#allocation5] ss:$0 sm:$0xff] }
  0x1b   :  { %49 = vperm.xlu0 %344, %v38_v2   ;;  %65 = vperm.xlu1 %346, %v38_v2   ;;  %v43_v7 = vshrl.u32 %v42_v5, 7  ;;  %vm40_vm0 = vcmp.eq.f32.partialorder %v39_v6, 1.0  ;;  %vm57_vm1 = vcmp.eq.f32.partialorder %v39_v6, 2.0  ;;  %vm69_vm2 = vcmp.eq.f32.partialorder %v39_v6, 3.0  ;;  %s431_s0 = smov [#allocation7]  }
  0x1c   :  { %v41_v9 = vsel %vm40_vm0, 1, %v423_v3  ;;  %v58_v10 = vsel %vm57_vm1, 1, %v423_v3  ;;  %v70_v11 = vsel %vm69_vm2, 1, %v423_v3  ;;  %v425_v34 = vmov 683565275   ;;  %s308_s1 = sshll.u32 %s431_s0, 4  ;;  %s309_s1 = int_to_ptr.vmem [resolvable:$true] %s308_s1 }
  0x1d   :  { %v454_v8 = vsub.s32 0, %v43_v7  ;;  %v426_v36 = vmov 2475754826   ;;  %v427_v39 = vmov 2131351028   ;;  %s393_s19 = scalar_lea.vmem %s309_s1, 32  ;;  %p398_p11 = scmp.lt.s32.totalorder %s309_s1, %s309_s1 }
  0x1e   :  { %v428_v42 = vmov 2102212464   ;;  %v429_v45 = vmov 920167782   ;;  %v430_v48 = vmov 1326507024   ;;  %p394_p10 = scmp.ne.s32.totalorder %s309_s1, %s393_s19  ;;  %p399_p12 = scmp.lt.s32.totalorder %s393_s19, %s393_s19 }
  0x1f   :  { %345 = vset.pattern.permute.xlu0 %v423_v3  ;;  %347 = vset.pattern.permute.xlu1 %v424_v4  ;;  %v45_v12 = vrot.slane %v41_v9, %v454_v8  ;;  %v62_v15 = vrot.slane %v58_v10, %v454_v8  ;;  %v74_v16 = vrot.slane %v70_v11, %v454_v8 }
  0x20   :  { %53 = vperm.xlu0 %345, %v38_v2   ;;  %77 = vperm.xlu1 %347, %v38_v2   ;;  %p400_p13 = por %p399_p12, %p398_p11 }
  0x21   :  { %vm46_vm3 = vcmp.eq.s32.totalorder %v45_v12, 1  ;;  %vm63_vm4 = vcmp.eq.s32.totalorder %v62_v15, 1  ;;  %vm75_vm5 = vcmp.eq.s32.totalorder %v74_v16, 1 }
  0x22   :  { %p401_p0 = pnand %p400_p13, %p394_p10 }
  0x24   :  { %348 = vset.pattern.permute.xlu0 %v424_v4 }
  0x96   :  { %v50_v13 = vpop.permute.xlu0 %49  ;;  %v66_v14 = vpop.permute.xlu1 %65 }
  0x9b   :  { %v54_v17 = vpop.permute.xlu0 %53  ;;  %v78_v18 = vpop.permute.xlu1 %77 }
  0x9c   :  { %v56_v19 = vsel %vm46_vm3, %v50_v13, %v54_v17 }
  0x9d   :  { %v68_v21 = vsel %vm63_vm4, %v66_v14, %v56_v19 }
  0x9e   :  { %v80_v22 = vsel %vm75_vm5, %v78_v18, %v68_v21 }
  0x9f   :  { %v462_v23 = vmul.f32 %v318_v20, %v80_v22 }
  0xa1   :  { %v90_v24 = vand.u32 2139095040, %v462_v23  ;;  %v87_v28 = vand.u32 2147483647, %v462_v23  ;;  %vm89_vm13 = vcmp.lt.s32.totalorder %v462_v23, 0 }
  0xa3   :  { %v91_v25 = vshrl.u32 %v90_v24, 23  ;;  %v94_v31 = vand.u32 8388607, %v87_v28  ;;  %vm88_vm14 = vcmp.le.f32.partialorder %v87_v28, 0.7853982 }
  0xa5   :  { %v319_v26 = vadd.s32 4294967169, %v91_v25  ;;  %v95_v50 = vor.u32 8388608, %v94_v31 }
  0xa7   :  { %v97_v27 = vadd.s32 1, %v319_v26  ;;  %v135_v0 = vshll.u32 %v95_v50, 8 }
  0xa9   :  { %vm98_vm6 = vcmp.gt.s32.totalorder %v97_v27, 0 }
  0xaa   :  { %v99_v29 = vsel %vm98_vm6, %v97_v27, 0 }
  0xab   :  { %v101_v30 = vand.u32 31, %v99_v29  ;;  %v100_v33 = vshrl.u32 %v99_v29, 5 }
  0xad   :  { %v102_v32 = vsub.s32 32, %v101_v30  ;;  %v104_v35 = vshll.u32 %v425_v34, %v101_v30  ;;  %v107_v37 = vshll.u32 %v426_v36, %v101_v30  ;;  %v110_v41 = vshll.u32 %v427_v39, %v101_v30 }
  0xae   :  { %v113_v44 = vshll.u32 %v428_v42, %v101_v30  ;;  %v116_v47 = vshll.u32 %v429_v45, %v101_v30  ;;  %vm119_vm7 = vcmp.lt.s32.totalorder %v100_v33, 1  ;;  %vm122_vm8 = vcmp.lt.s32.totalorder %v100_v33, 4 }
  0xaf   :  { %v105_v38 = vshrl.u32 %v426_v36, %v102_v32  ;;  %v108_v40 = vshrl.u32 %v427_v39, %v102_v32  ;;  %v111_v43 = vshrl.u32 %v428_v42, %v102_v32  ;;  %v114_v46 = vshrl.u32 %v429_v45, %v102_v32 }
  0xb0   :  { %v117_v49 = vshrl.u32 %v430_v48, %v102_v32  ;;  %v103_v59 = vshrl.u32 %v425_v34, %v102_v32  ;;  %vm121_vm9 = vcmp.lt.s32.totalorder %v100_v33, 3  ;;  %vm120_vm10 = vcmp.lt.s32.totalorder %v100_v33, 2 }
  0xb1   :  { %v106_v51 = vor.u32 %v105_v38, %v104_v35  ;;  %v109_v52 = vor.u32 %v108_v40, %v107_v37  ;;  %v112_v53 = vor.u32 %v111_v43, %v110_v41  ;;  %v115_v54 = vor.u32 %v114_v46, %v113_v44  ;;  %v37_v44 = vld [vmem:[#allocation5 + $0x1] sm:$0x1] }
  0xb2   :  { %v118_v55 = vor.u32 %v117_v49, %v116_v47  ;;  %vm86_vm15 = vcmp.ne.f32.partialorder %v37_v44, 0.0 }
  0xb3   :  { %v124_v56 = vsel %vm122_vm8, %v112_v53, 2102212464  ;;  %v127_v57 = vsel %vm119_vm7, %v106_v51, %v109_v52  ;;  %v131_v58 = vsel %vm119_vm7, %v109_v52, %v112_v53  ;;  %v128_v60 = vsel %vm122_vm8, %v115_v54, 920167782 }
  0xb4   :  { %v132_v61 = vsel %vm122_vm8, %v118_v55, 1326507024  ;;  %v129_v62 = vsel %vm121_vm9, %v112_v53, %v128_v60  ;;  %v123_v1 = vsel %vm119_vm7, %v103_v59, %v106_v51  ;;  %v125_v2 = vsel %vm121_vm9, %v109_v52, %v124_v56 }
  0xb5   :  { %v133_v63 = vsel %vm121_vm9, %v115_v54, %v132_v61  ;;  %v130_v4 = vsel %vm120_vm10, %v127_v57, %v129_v62  ;;  %v126_v11 = vsel %vm120_vm10, %v123_v1, %v125_v2  ;;  %v294_v47 = vsel %vm86_vm15, 1, %v423_v3 }
  0xb6   :  { %v134_v5 = vsel %vm120_vm10, %v131_v58, %v133_v63  ;;  %v471_v9 = vmul.u32.u64.low %v135_v0, %v130_v4  ;;  %v472_v10 = vmul.u32.u64.high %v135_v0, %v130_v4, %v471_v9  ;;  %v142_v13 = vmul.u32 %v135_v0, %v126_v11 }
  0xb7   :  { %v468_v6 = vmul.u32.u64.low %v135_v0, %v134_v5  ;;  %v469_v7 = vmul.u32.u64.high %v135_v0, %v134_v5, %v468_v6  ;;  %v298_v50 = vrot.slane %v294_v47, %v454_v8  ;;  %vm179_vm7 = vweird.f32 %v462_v23 }
  0xb8   :  { %v145_v12 = vadd.s32 1, %v472_v10 }
  0xb9   :  { %vm144_vm11 = vc.u32 %v469_v7, %v471_v9  ;;  %v143_v26 = vadd.s32 %v471_v9, %v469_v7  ;;  %vm484_vm2 = vcmp.eq.s32.totalorder %v298_v50, 1 }
  0xba   :  { %v146_v14 = vsel %vm144_vm11, %v145_v12, %v472_v10 }
  0xbb   :  { %v147_v15 = vadd.s32 %v146_v14, %v142_v13 }
  0xbd   :  { %v148_v16 = vadd.s32 536870912, %v147_v15 }
  0xbf   :  { %v149_v17 = vshrl.u32 %v148_v16, 30 }
  0xc1   :  { %v150_v18 = vshll.u32 %v149_v17, 30  ;;  %v173_v40 = vsub.s32 4, %v149_v17 }
  0xc3   :  { %v151_v19 = vsub.s32 %v147_v15, %v150_v18  ;;  %v174_v43 = vsel %vm89_vm13, %v173_v40, %v149_v17 }
  0xc4   :  { %v176_v45 = vsel %vm88_vm14, 0, %v174_v43 }
  0xc5   :  { %v153_v20 = vsub.s32 0, %v151_v19  ;;  %v180_v46 = vadd.s32 3, %v176_v45  ;;  %v284_v49 = vand.u32 3, %v176_v45 }
  0xc7   :  { %v320_v21 = vmin.u32 %v153_v20, %v151_v19  ;;  %v181_v48 = vand.u32 3, %v180_v46  ;;  %vm289_vm1 = vcmp.eq.s32.totalorder %v284_v49, 2  ;;  %vm286_vm4 = vcmp.eq.s32.totalorder %v284_v49, 0 }
  0xc8   :  { %vm285_vm6 = vcmp.lt.s32.totalorder %v284_v49, 2 }
  0xc9   :  { %v155_v22 = vclz %v320_v21  ;;  %vm186_vm0 = vcmp.eq.s32.totalorder %v181_v48, 2  ;;  %vm183_vm3 = vcmp.eq.s32.totalorder %v181_v48, 0  ;;  %vm182_vm5 = vcmp.lt.s32.totalorder %v181_v48, 2 }
  0xcb   :  { %v321_v24 = vadd.s32 4294967294, %v155_v22 }
  0xcd   :  { %vm322_vm12 = vcmp.lt.s32.totalorder %v321_v24, 0 }
  0xce   :  { %v158_v25 = vsel %vm322_vm12, 0, %v321_v24 }
  0xcf   :  { %v159_v27 = vsub.s32 32, %v158_v25  ;;  %v163_v29 = vsub.s32 4294967266, %v158_v25  ;;  %v160_v30 = vshll.u32 %v151_v19, %v158_v25 }
  0xd1   :  { %v161_v31 = vshrl.u32 %v143_v26, %v159_v27  ;;  %v164_v32 = vadd.s32 127, %v163_v29 }
  0xd3   :  { %v162_v33 = vor.u32 %v161_v31, %v160_v30  ;;  %v165_v34 = vshll.u32 %v164_v32, 23 }
  0xd5   :  { %v166_v35 = vor.u32 4788187, %v165_v34  ;;  %v169_v37 = vcvt.s32.f32 %v162_v33 }
  0xd7   :  { %v167_v36 = vand.u32 2147483647, %v166_v35 }
  0xd9   :  { %v170_v38 = vmul.f32 %v169_v37, %v167_v36 }
  0xdb   :  { %v171_v39 = vxor.u32 2147483648, %v170_v38 }
  0xdd   :  { %v172_v41 = vsel %vm89_vm13, %v171_v39, %v170_v38 }
  0xde   :  { %v175_v42 = vsel %vm88_vm14, %v462_v23, %v172_v41 }
  0xdf   :  { %349 = vcosq.f32 %v175_v42 }
  0xe0   :  { %351 = vsinq.f32 %v175_v42 }
  0xec   :  { %v350_v51 = vpop.eup %349 }
  0xed   :  { %v352_v52 = vpop.eup %351  ;;  %v187_v53 = vxor.u32 2147483648, %v350_v51 }
  0xee   :  { %v184_v54 = vxor.u32 2147483648, %v352_v52 }
  0xef   :  { %v188_v55 = vsel %vm186_vm0, %v187_v53, %v352_v52  ;;  %v291_v56 = vsel %vm289_vm1, %v187_v53, %v352_v52 }
  0xf0   :  { %v185_v3 = vsel %vm183_vm3, %v350_v51, %v184_v54  ;;  %v288_v8 = vsel %vm286_vm4, %v350_v51, %v184_v54 }
  0xf1   :  { %v189_v57 = vsel %vm182_vm5, %v185_v3, %v188_v55  ;;  %v292_v58 = vsel %vm285_vm6, %v288_v8, %v291_v56 }
  0xf2   :  { %v190_v59 = vsel %vm179_vm7, nan, %v189_v57  ;;  %v293_v60 = vsel %vm179_vm7, nan, %v292_v58 }
  0xf3   :  { %v300_v61 = vsel %vm484_vm2, %v190_v59, %v293_v60 }
  0xf4   :  { %301 = vst [vmem:[#allocation7] sm:$0x3] %v300_v61 }
  0xf5   :  { %404 = shalt.err (!%p401_p0)
}
  0xf6   :  { %311 = dma.vmem_to_hbm [thread:$0]  %s309_s1, 32, %s496_s2, [#allocation4]  }
  0xf7   :  { %417 = dma.done.wait [#allocation4], 32  }
  0xf8   :  { %418 = vsyncadd [#allocation4], 4294967264 }
  0xf9   :  { %315 = vsyncpa [#allocation3], 1 }
  0xfa   :  { %316 = vsyncpa [#allocation6], 1 }
  0xfb   :  { %317 = vsyncpa [#allocation4], 1 }

</bundles_post_ra>
